<compile_context>
chip_gen: v7x
topology: tpu7x:2x2x1
jax: 0.10.0
libtpu: 0.0.40
codegen_flags: <defaults>
</compile_context>

<pallas_src>
import functools

import jax
import jax.numpy as jnp
from jax.experimental import pallas as pl
from jax.experimental.pallas import tpu as pltpu


def _round_up(x, m):
    return ((x + m - 1) // m) * m


def _sublane_multiple(dtype):
    # Min sublane tile: 8 for 4-byte, 16 for 2-byte, 32 for 1-byte dtypes.
    itemsize = jnp.dtype(dtype).itemsize
    return max(8, 32 // max(1, itemsize))


def _pick_tile_rows(oh, hb, tile_rows):
    # Aim for >= ~8 row tiles (software-pipeline depth, both v7x TCs busy,
    # small over-padding), capped at tile_rows so f32 intermediates stay
    # within a few MiB of VMEM and vreg pressure is bounded.
    target = _round_up(max(1, (oh + 7) // 8), hb)
    cap = _round_up(max(tile_rows, hb), hb)
    return max(hb, min(cap, target))


def _corr2d_kernel(w_ref, b_ref, xm_ref, xh_ref, o_ref, *, kh, kw):
    """One row-tile of corr2d(x, w) + bias.

    w_ref  : SMEM (kh*kw,) flattened f32 weights
    b_ref  : SMEM (1,) f32 bias
    xm_ref : VMEM (th, w_pad)  main input tile (rows t*th .. t*th+th-1)
    xh_ref : VMEM (hb, w_pad)  halo tile (rows t*th+th .. t*th+th+hb-1)
    o_ref  : VMEM (th, w_pad)  lane-dense output tile
    """
    th, tw = o_ref.shape

    # Hoist all kh*kw scalar weights (one SMEM read each).
    w = [w_ref[i] for i in range(kh * kw)]

    # Extended slab: this tile's rows plus the halo rows needed by the last
    # kh-1 output rows.  Both pieces are sublane-aligned, so this is a cheap
    # aligned concat; the per-tap row shifts below are static slices.
    xext = jnp.concatenate([xm_ref[...], xh_ref[...]], axis=0).astype(jnp.float32)
    rows = [xext[a:a + th] for a in range(kh)]

    # Bias folded into the accumulator init (saves one full-tile add pass).
    acc = jnp.full((th, tw), b_ref[0], jnp.float32)

    # Column-major tap order: sum the kh row-weighted slabs first, then shift
    # lanes once per b -> only (kw-1) XLU rolls instead of kh*(kw-1).
    for b in range(kw):
        col = rows[0] * w[b]
        for a in range(1, kh):
            col = col + rows[a] * w[a * kw + b]
        if b > 0:
            # Left-shift by b lanes; wrapped lanes land in padded columns
            # >= ow, which the wrapper slices away (w_pad >= W guarantees it).
            col = pltpu.roll(col, tw - b, axis=1)
        acc = acc + col

    o_ref[...] = acc.astype(o_ref.dtype)


def conv2d_forward(x, weight, bias, *, tile_rows=128):
    """Pallas equivalent of `corr2d(x, self.weight) + self.bias`."""
    kh, kw = weight.shape
    H, W = x.shape
    oh, ow = H - kh + 1, W - kw + 1
    assert oh >= 1 and ow >= 1, "kernel larger than image"

    mult = _sublane_multiple(x.dtype)
    w_pad = _round_up(max(W, 128), 128)
    # Roll-wrap invariant: for valid output column j (< ow) and tap b (< kw),
    # j + b <= W - 1 <= w_pad - 1, so wrapped lanes never touch valid columns.
    assert ow + (kw - 1) <= w_pad, "lane-roll wrap would corrupt valid columns"

    hb = _round_up(max(kh - 1, 1), mult)      # halo rows (>= kh-1, sublane aligned)
    th = _pick_tile_rows(oh, hb, tile_rows)   # row tile, multiple of hb (and mult)
    n_tiles = (oh + th - 1) // th
    h_pad = n_tiles * th + hb                 # main tiles + last tile's halo block

    if (h_pad, w_pad) == (H, W):
        x_p = x                               # skip the wrapper-side pad pass
    else:
        x_p = jnp.zeros((h_pad, w_pad), x.dtype).at[:H, :W].set(x)
    # TODO(synk): on mem-bound v5e the pad/slice are extra HBM passes; fuse
    # them with the producer/consumer when this is embedded in a larger graph.

    w_flat = weight.reshape(-1).astype(jnp.float32)   # 1-D f32 scalars in SMEM
    b_flat = bias.reshape(-1).astype(jnp.float32)

    # VMEM budget: double-buffered x (main+halo) and output tiles + f32
    # intermediates.  Only raise the scoped limit when we'd exceed v5e's
    # 16 MiB default; cap with headroom below physical ceilings.
    itemsize = jnp.dtype(x.dtype).itemsize
    vmem_need = (2 * (th + hb) * w_pad + 2 * th * w_pad) * itemsize \
                + (kh + 4) * th * w_pad * 4
    vmem_limit = None
    if vmem_need > (16 << 20):
        vmem_limit = int(min(vmem_need + (8 << 20), 100 << 20))

    halo_stride = th // hb                    # th is a multiple of hb by construction
    kernel = functools.partial(_corr2d_kernel, kh=kh, kw=kw)

    out_full = pl.pallas_call(
        kernel,
        out_shape=jax.ShapeDtypeStruct((n_tiles * th, w_pad), x.dtype),
        grid=(n_tiles,),
        in_specs=[
            pl.BlockSpec(memory_space=pltpu.MemorySpace.SMEM),       # weights
            pl.BlockSpec(memory_space=pltpu.MemorySpace.SMEM),       # bias
            pl.BlockSpec((th, w_pad), lambda t: (t, 0)),             # x main tile
            pl.BlockSpec((hb, w_pad),
                         lambda t: ((t + 1) * halo_stride, 0)),      # x halo tile
        ],
        out_specs=pl.BlockSpec((th, w_pad), lambda t: (t, 0)),       # lane-dense out
        compiler_params=pltpu.CompilerParams(
            dimension_semantics=("parallel",),                       # 2 TCs on v7x
            vmem_limit_bytes=vmem_limit,
        ),
    )(w_flat, b_flat, x_p, x_p)

    if out_full.shape == (oh, ow):
        return out_full
    return out_full[:oh, :ow]
    # TODO(synk): for batched / multi-channel conv, add a batch grid axis or
    # reformulate as im2col + MXU matmul once there is a >=128-wide channel
    # contraction to fill the MXU (not worth it for this 1-filter module).


def _reference(x, weight, bias):
    """Pure-JAX reference of corr2d + bias (for correctness check)."""
    kh, kw = weight.shape
    H, W = x.shape
    oh, ow = H - kh + 1, W - kw + 1
    acc = jnp.zeros((oh, ow), jnp.float32)
    for a in range(kh):
        for b in range(kw):
            acc = acc + x[a:a + oh, b:b + ow] * weight[a, b]
    return acc + bias[0]


if __name__ == "__main__":
    key = jax.random.PRNGKey(0)

    # Small shapes consistent with the module (single 2-D image, small kernel).
    configs = [
        (16, 16, 3, 3),    # 2 row tiles; last tile's halo is zero padding
        (18, 16, 3, 3),    # last tile's valid rows need real halo rows
        (20, 140, 3, 4),   # W > 128 (two lane groups), kh != kw
    ]

    for idx, (H, W, kh, kw) in enumerate(configs):
        k_x, k_w, k_b, key = jax.random.split(key, 4)
        x = jax.random.normal(k_x, (H, W), dtype=jnp.float32)
        weight = jax.random.normal(k_w, (kh, kw), dtype=jnp.float32)  # nn.Parameter(randn(kernel_size))
        bias = jax.random.normal(k_b, (1,), dtype=jnp.float32)        # nn.Parameter(randn(1))

        out = jax.block_until_ready(conv2d_forward(x, weight, bias))
        ref = _reference(x, weight, bias)
        assert out.shape == (H - kh + 1, W - kw + 1), f"shape mismatch in config {idx}"
        assert jnp.allclose(out, ref, atol=1e-5, rtol=1e-5), f"value mismatch in config {idx}"

    print("KERNEL_OK")
</pallas_src>

<mosaic_0001>
module attributes {stable_mosaic.version = 11 : i64} {
  func.func @_corr2d_kernel(%arg0: i32, %arg1: memref<9xf32, #tpu.memory_space<smem>>, %arg2: memref<1xf32, #tpu.memory_space<smem>>, %arg3: memref<8x128xf32, #tpu.memory_space<vmem>>, %arg4: memref<8x128xf32, #tpu.memory_space<vmem>>, %arg5: memref<8x128xf32, #tpu.memory_space<vmem>>) attributes {dimension_semantics = [#tpu.dimension_semantics<parallel>], iteration_bounds = array<i64: 2>, scalar_prefetch = 0 : i64, scratch_operands = 0 : i64, tpu.core_type = #tpu.core_type<tc>, window_params = [{transform_indices = @transform_0, window_bounds = array<i64: 9>}, {transform_indices = @transform_1, window_bounds = array<i64: 1>}, {transform_indices = @transform_2, window_bounds = array<i64: 8, 128>}, {transform_indices = @transform_3, window_bounds = array<i64: 8, 128>}, {transform_indices = @transform_4, window_bounds = array<i64: 8, 128>}]} {
    %c0 = arith.constant 0 : index
    %0 = memref.load %arg1[%c0] : memref<9xf32, #tpu.memory_space<smem>>
    %c1 = arith.constant 1 : index
    %1 = memref.load %arg1[%c1] : memref<9xf32, #tpu.memory_space<smem>>
    %c2 = arith.constant 2 : index
    %2 = memref.load %arg1[%c2] : memref<9xf32, #tpu.memory_space<smem>>
    %c3 = arith.constant 3 : index
    %3 = memref.load %arg1[%c3] : memref<9xf32, #tpu.memory_space<smem>>
    %c4 = arith.constant 4 : index
    %4 = memref.load %arg1[%c4] : memref<9xf32, #tpu.memory_space<smem>>
    %c5 = arith.constant 5 : index
    %5 = memref.load %arg1[%c5] : memref<9xf32, #tpu.memory_space<smem>>
    %c6 = arith.constant 6 : index
    %6 = memref.load %arg1[%c6] : memref<9xf32, #tpu.memory_space<smem>>
    %c7 = arith.constant 7 : index
    %7 = memref.load %arg1[%c7] : memref<9xf32, #tpu.memory_space<smem>>
    %c8 = arith.constant 8 : index
    %8 = memref.load %arg1[%c8] : memref<9xf32, #tpu.memory_space<smem>>
    %c0_0 = arith.constant 0 : index
    %c0_1 = arith.constant 0 : index
    %9 = vector.load %arg3[%c0_0, %c0_1] : memref<8x128xf32, #tpu.memory_space<vmem>>, vector<8x128xf32>
    %c0_2 = arith.constant 0 : index
    %c0_3 = arith.constant 0 : index
    %10 = vector.load %arg4[%c0_2, %c0_3] : memref<8x128xf32, #tpu.memory_space<vmem>>, vector<8x128xf32>
    %11 = tpu.concatenate %9, %10 in 0 : vector<8x128xf32>, vector<8x128xf32> -> vector<16x128xf32>
    %12 = vector.extract_strided_slice %11 {offsets = [0, 0], sizes = [8, 128], strides = [1, 1]} : vector<16x128xf32> to vector<8x128xf32>
    %13 = vector.extract_strided_slice %11 {offsets = [1, 0], sizes = [8, 128], strides = [1, 1]} : vector<16x128xf32> to vector<8x128xf32>
    %14 = vector.extract_strided_slice %11 {offsets = [2, 0], sizes = [8, 128], strides = [1, 1]} : vector<16x128xf32> to vector<8x128xf32>
    %c0_4 = arith.constant 0 : index
    %15 = memref.load %arg2[%c0_4] : memref<1xf32, #tpu.memory_space<smem>>
    %16 = vector.broadcast %15 : f32 to vector<8x128xf32>
    %17 = vector.broadcast %0 : f32 to vector<8x128xf32>
    %18 = arith.mulf %12, %17 : vector<8x128xf32>
    %19 = vector.broadcast %3 : f32 to vector<8x128xf32>
    %20 = arith.mulf %13, %19 : vector<8x128xf32>
    %21 = arith.addf %18, %20 : vector<8x128xf32>
    %22 = vector.broadcast %6 : f32 to vector<8x128xf32>
    %23 = arith.mulf %14, %22 : vector<8x128xf32>
    %24 = arith.addf %21, %23 : vector<8x128xf32>
    %25 = arith.addf %16, %24 : vector<8x128xf32>
    %26 = vector.broadcast %1 : f32 to vector<8x128xf32>
    %27 = arith.mulf %12, %26 : vector<8x128xf32>
    %28 = vector.broadcast %4 : f32 to vector<8x128xf32>
    %29 = arith.mulf %13, %28 : vector<8x128xf32>
    %30 = arith.addf %27, %29 : vector<8x128xf32>
    %31 = vector.broadcast %7 : f32 to vector<8x128xf32>
    %32 = arith.mulf %14, %31 : vector<8x128xf32>
    %33 = arith.addf %30, %32 : vector<8x128xf32>
    %c127_i32 = arith.constant 127 : i32
    %34 = tpu.dynamic_rotate %33 by %c127_i32 dim 1 : vector<8x128xf32>, i32 -> vector<8x128xf32>
    %35 = arith.addf %25, %34 : vector<8x128xf32>
    %36 = vector.broadcast %2 : f32 to vector<8x128xf32>
    %37 = arith.mulf %12, %36 : vector<8x128xf32>
    %38 = vector.broadcast %5 : f32 to vector<8x128xf32>
    %39 = arith.mulf %13, %38 : vector<8x128xf32>
    %40 = arith.addf %37, %39 : vector<8x128xf32>
    %41 = vector.broadcast %8 : f32 to vector<8x128xf32>
    %42 = arith.mulf %14, %41 : vector<8x128xf32>
    %43 = arith.addf %40, %42 : vector<8x128xf32>
    %c126_i32 = arith.constant 126 : i32
    %44 = tpu.dynamic_rotate %43 by %c126_i32 dim 1 : vector<8x128xf32>, i32 -> vector<8x128xf32>
    %45 = arith.addf %35, %44 : vector<8x128xf32>
    %c0_5 = arith.constant 0 : index
    %c0_6 = arith.constant 0 : index
    %46 = vector.load %arg5[%c0_5, %c0_6] : memref<8x128xf32, #tpu.memory_space<vmem>>, vector<8x128xf32>
    tpu.vector_store %arg5[%c0_5, %c0_6], %45 {strides = array<i32>} : memref<8x128xf32, #tpu.memory_space<vmem>>, vector<8x128xf32>,
    return
  }
  func.func @transform_0(%arg0: i32) -> i32 {
    %c0_i32 = arith.constant 0 : i32
    %c0_i32_0 = arith.constant 0 : i32
    return %c0_i32 : i32
  }
  func.func @transform_1(%arg0: i32) -> i32 {
    %c0_i32 = arith.constant 0 : i32
    %c0_i32_0 = arith.constant 0 : i32
    return %c0_i32 : i32
  }
  func.func @transform_2(%arg0: i32) -> (i32, i32) {
    %c0_i32 = arith.constant 0 : i32
    %c0_i32_0 = arith.constant 0 : i32
    return %arg0, %c0_i32 : i32, i32
  }
  func.func @transform_3(%arg0: i32) -> (i32, i32) {
    %c1_i32 = arith.constant 1 : i32
    %0 = arith.addi %arg0, %c1_i32 : i32
    %c1_i32_0 = arith.constant 1 : i32
    %1 = arith.muli %0, %c1_i32_0 : i32
    %c0_i32 = arith.constant 0 : i32
    %c0_i32_1 = arith.constant 0 : i32
    return %1, %c0_i32 : i32, i32
  }
  func.func @transform_4(%arg0: i32) -> (i32, i32) {
    %c0_i32 = arith.constant 0 : i32
    %c0_i32_0 = arith.constant 0 : i32
    return %arg0, %c0_i32 : i32, i32
  }
}

</mosaic_0001>

<bundles_post_ra>
// kernel: tpu_custom_call.1
= control target key start
LH: loop header
LB: loop body
LE: loop exit
PB: predicated region body
PF: predicated region fallthrough
CT: control target
= control target key end

     0   :  { %s1093_s0 = inlined_call_operand.vmem [shape: f32[9], index: 0, kind: input, shape index: {}]   ;;  %s1094_s1 = inlined_call_operand.<no memory space> [shape: f32[1], index: 1, kind: input, shape index: {}]   ;;  %s1095_s2 = inlined_call_operand.hbm [shape: f32[24,128], index: 2, kind: input, shape index: {}]   ;;  %s1096_s3 = inlined_call_operand.hbm [shape: f32[24,128], index: 3, kind: input, shape index: {}]   ;;  %s1097_s4 = inlined_call_operand.hbm [shape: f32[16,128], index: 4, kind: output, shape index: {}]  }
   0x1   :  { %9 = sst [smem:[#allocation2]] %s1094_s1 }
   0x2   :  { %10 = vsyncpa [#allocation6], 0 }
   0x3   :  { %11 = vsyncpa [#allocation4], 0 }
   0x4   :  { %13 = vsyncpa [#allocation4 + $0x1], 0 }
   0x5   :  { %14 = vsyncpa [#allocation9], 0 }
   0x6   :  { %16 = vsyncpa [#allocation9 + $0x1], 0 }
   0x7   :  { %17 = vsyncpa [#allocation5], 0 }
   0x8   :  { %19 = vsyncpa [#allocation5 + $0x1], 0  ;;  %s801_s17 = smov 0   ;;  %s803_s18 = smov 0  }
   0x9   :  { %s805_s19 = smov 0   ;;  %s807_s20 = smov 0  }
   0xa   :  { %s809_s21 = smov 0   ;;  %s811_s22 = smov 0  }
   0xb   :  { %s813_s1 = smov 0  }
   0xc LB: > { %s165_s25 = sshll.u32 %s1093_s0, 4  ;;  %s840_s26 = sadd.s32 4294967295, %s765_s1   ;;  %s765_s1 = sphi %s813_s1, %s1130_s1   ;;  %s761_s22 = sphi %s811_s22, %s1129_s22   ;;  %s757_s21 = sphi %s809_s21, %s1128_s21   ;;  %s753_s20 = sphi %s807_s20, %s1127_s20   ;;  %s749_s19 = sphi %s805_s19, %s1126_s19   ;;  %s745_s18 = sphi %s803_s18, %s1125_s18   ;;  %s741_s17 = sphi %s801_s17, %s1124_s17   ;;  %s166_s25 = int_to_ptr.vmem [resolvable:$true] %s165_s25 }
   0xd   : > { %p479_p0 = scmp.ge.s32.totalorder %s765_s1, 1  ;;  %p1099_p1 = scmp.eq.s32.totalorder %s840_s26, 0 }
   0xe   : > { %p139_p2 = scmp.eq.s32.totalorder %s840_s26, 1  ;;  %p152_p3 = scmp.lt.s32.totalorder %s765_s1, 3 }
   0xf   : > { %s478_s29 = sadd.s32 4294967294, %s765_s1   ;;  %s861_s30 = sadd.s32 1, %s765_s1  }
  0x10   : > { %p847_p5 = pnand %p479_p0, %p152_p3  ;;  %s74_s5 = sadd.s32 1, %s761_s22 }
  0x11   : > { %s71_s6 = ssub.s32 %s765_s1, %s861_s30  ;;  %s591_s7 = scalar_lea.vmem %s166_s25, 16 }
  0x12   : > { %p513_p6 = pneg %p847_p5  ;;  %p592_p8 = scmp.ne.s32.totalorder %s166_s25, %s591_s7 }
  0x13   : > { %p599_p12 = scmp.lt.s32.totalorder %s166_s25, %s166_s25  ;;  %p600_p13 = scmp.lt.s32.totalorder %s591_s7, %s591_s7 }
  0x14   : > { %p855_p7 = pnand %p513_p6, %p1099_p1 }
  0x15   : > { %p601_p0 = por %p600_p13, %p599_p12 }
  0x16   : > { %p593_p9 = pneg %p855_p7 }
  0x18   : > { %p594_p10 = pnand %p593_p9, %p592_p8 }
  0x1a   : > { %p595_p11 = pneg %p594_p10 }
  0x1c   : > { %p602_p3 = pnand %p601_p0, %p595_p11 }
  0x1e   : > { %605 = shalt.err (!%p602_p3)
}
  0x1f   : > { %s767_s8 = smov [#allocation3]   ;;  %p72_p6 = scmp.eq.s32.totalorder %s71_s6, 0 }
  0x20   : > { %516 = dma.vmem_to_smem (!%p855_p7), %s166_s25, 16, %s767_s8, [#allocation6]  }
  0x21   : > { %p81_p8 = scmp.ne.s32.totalorder %s761_s22, %s757_s21  ;;  %p1100_p9 = scmp.eq.s32.totalorder %s765_s1, 0 }
  0x22   : > { %p87_p10 = scmp.ne.s32.totalorder %s757_s21, %s753_s20  ;;  %p145_p7 = scmp.eq.s32.totalorder %s478_s29, 1 }
  0x23   : > { %s876_s9 = scalar_select %p72_p6, %s761_s22, %s74_s5  }
  0x24   : > { %p83_p11 = por %p1100_p9, %p81_p8  ;;  %p882_p12 = por %p1099_p1, %p87_p10 }
  0x25   : > { %p888_p13 = por %p139_p2, %p81_p8  ;;  %p1098_p0 = scmp.lt.s32.totalorder %s765_s1, 2 }
  0x26   : > { %s1107_s10 = scalar_select %p882_p12, 1, 0 }
  0x27   : > { %s1108_s11 = scalar_select %p888_p13, 1, 0 }
  0x28   : > { %s179_s12 = sand.u32 1, %s761_s22   ;;  %p894_p3 = por %p145_p7, %p87_p10 }
  0x29   : > { %s482_s14 = sshll.u32 %s179_s12, 3  ;;  %s483_s15 = sshll.u32 %s765_s1, 7 }
  0x2a   : > { %s1109_s13 = scalar_select %p894_p3, 1, 0 }
  0x2b   : > { %s904_s24 = scalar_lea.hbm %s1095_s2, %s483_s15  ;;  %s183_s25 = scalar_lea.vmem [#allocation7], %s482_s14 }
  0x2c   : > { %s190_s28 = sshll.u32 %s183_s25, 4  ;;  %p908_p2 = pnand %p1098_p0, %p83_p11  ;;  %s912_s28 = int_to_ptr.vmem [resolvable:$true] %s190_s28 }
  0x2d   : > { %s180_s5 = scalar_lea.sflag [#allocation4], %s179_s12  ;;  %s606_s6 = scalar_lea.hbm %s904_s24, 128 }
  0x2e   : > { %p607_p6 = scmp.ne.s32.totalorder %s904_s24, %s606_s6  ;;  %p608_p8 = pneg %p908_p2 }
  0x2f   : > { %s611_s14 = scalar_lea.hbm %s1095_s2, 384  ;;  %p612_p11 = scmp.lt.u32.totalorder %s904_s24, %s1095_s2 }
  0x30   : > { %p609_p10 = pnand %p608_p8, %p607_p6  ;;  %p613_p4 = scmp.lt.u32.totalorder %s611_s14, %s606_s6 }
  0x31   : > { %p615_p1 = scmp.lt.u32.totalorder %s606_s6, %s904_s24 }
  0x32   : > { %p610_p7 = pneg %p609_p10  ;;  %p614_p0 = por %p613_p4, %p612_p11 }
  0x34   : > { %p616_p9 = por %p615_p1, %p614_p0 }
  0x36   : > { %p617_p3 = pnand %p616_p9, %p610_p7 }
  0x38   : > { %620 = shalt.err (!%p617_p3)
}
  0x39   : > { %s621_s12 = scalar_lea.vmem %s912_s28, 128  ;;  %s768_s25 = smov [#allocation7]  }
  0x3a   : > { %p622_p6 = scmp.ne.s32.totalorder %s912_s28, %s621_s12  ;;  %s626_s7 = sshll.u32 %s768_s25, 4  ;;  %s627_s7 = int_to_ptr.vmem [resolvable:$false] %s626_s7 }
  0x3b   : > { %s628_s8 = scalar_lea.vmem %s627_s7, 256  ;;  %p629_p12 = scmp.lt.s32.totalorder %s912_s28, %s627_s7 }
  0x3c   : > { %p624_p10 = pnand %p622_p6, %p608_p8  ;;  %p630_p4 = scmp.lt.s32.totalorder %s628_s8, %s621_s12 }
  0x3e   : > { %p625_p13 = pneg %p624_p10  ;;  %p631_p11 = por %p630_p4, %p629_p12 }
  0x40   : > { %p632_p1 = pnand %p631_p11, %p625_p13 }
  0x42   : > { %635 = shalt.err (!%p632_p1)
}
  0x43   : > { %520 = dma.hbm_to_vmem [thread:$0]  (!%p908_p2), %s904_s24, 128, %s912_s28, %s180_s5  }
  0x44   : > { %s98_s6 = sadd.s32 1, %s861_s30  ;;  %s102_s14 = sadd.s32 1, %s749_s19 }
  0x45   : > { %s99_s16 = ssub.s32 %s861_s30, %s98_s6  ;;  %p109_p9 = scmp.ne.s32.totalorder %s749_s19, %s745_s18 }
  0x46   : > { %p100_p12 = scmp.eq.s32.totalorder %s99_s16, 0  ;;  %p115_p13 = scmp.ne.s32.totalorder %s745_s18, %s741_s17 }
  0x47   : > { %p1111_p0 = scmp.eq.s32.totalorder %s765_s1, 0  ;;  %s197_s29 = sand.u32 1, %s749_s19  }
  0x48   : > { %s950_s23 = scalar_select %p100_p12, %s749_s19, %s102_s14  }
  0x49   : > { %p111_p3 = por %p109_p9, %p1111_p0  ;;  %p1112_p8 = scmp.eq.s32.totalorder %s840_s26, 0 }
  0x4a   : > { %s484_s25 = sshll.u32 %s197_s29, 3  ;;  %s411_s5 = scalar_lea.hbm %s1096_s3, %s483_s15 }
  0x4b   : > { %p954_p7 = por %p115_p13, %p1112_p8  ;;  %s963_s7 = scalar_lea.hbm %s411_s5, 128 }
  0x4c   : > { %s201_s17 = scalar_lea.vmem [#allocation8], %s484_s25  ;;  %p1114_p2 = scmp.lt.s32.totalorder %s765_s1, 2 }
  0x4d   : > { %s1113_s12 = scalar_select %p954_p7, 1, 0 }
  0x4e   : > { %s209_s8 = sshll.u32 %s201_s17, 4  ;;  %p967_p6 = pnand %p1114_p2, %p111_p3  ;;  %s971_s8 = int_to_ptr.vmem [resolvable:$true] %s209_s8 }
  0x4f   : > { %s198_s14 = scalar_lea.sflag [#allocation9], %s197_s29  ;;  %s666_s16 = scalar_lea.hbm %s411_s5, 256 }
  0x50   : > { %p637_p10 = scmp.ne.s32.totalorder %s963_s7, %s666_s16  ;;  %p638_p4 = pneg %p967_p6 }
  0x51   : > { %s641_s24 = scalar_lea.hbm %s1096_s3, 384  ;;  %p642_p9 = scmp.lt.u32.totalorder %s963_s7, %s1096_s3 }
  0x52   : > { %p639_p11 = pnand %p638_p4, %p637_p10  ;;  %p643_p12 = scmp.lt.u32.totalorder %s641_s24, %s666_s16 }
  0x53   : > { %p645_p0 = scmp.lt.u32.totalorder %s666_s16, %s963_s7 }
  0x54   : > { %p640_p1 = pneg %p639_p11  ;;  %p644_p13 = por %p643_p12, %p642_p9 }
  0x56   : > { %p646_p3 = por %p645_p0, %p644_p13 }
  0x58   : > { %p647_p8 = pnand %p646_p3, %p640_p1 }
  0x5a   : > { %650 = shalt.err (!%p647_p8)
}
  0x5b   : > { %s651_s29 = scalar_lea.vmem %s971_s8, 128  ;;  %s769_s5 = smov [#allocation8]  }
  0x5c   : > { %p652_p2 = scmp.ne.s32.totalorder %s971_s8, %s651_s29  ;;  %s656_s15 = sshll.u32 %s769_s5, 4  ;;  %s657_s15 = int_to_ptr.vmem [resolvable:$false] %s656_s15 }
  0x5d   : > { %s658_s25 = scalar_lea.vmem %s657_s15, 256  ;;  %p659_p7 = scmp.lt.s32.totalorder %s971_s8, %s657_s15 }
  0x5e   : > { %p654_p10 = pnand %p652_p2, %p638_p4  ;;  %p660_p9 = scmp.lt.s32.totalorder %s658_s25, %s651_s29 }
  0x60   : > { %p655_p11 = pneg %p654_p10  ;;  %p661_p12 = por %p660_p9, %p659_p7 }
  0x62   : > { %p662_p13 = pnand %p661_p12, %p655_p11 }
  0x64   : > { %665 = shalt.err (!%p662_p13)
}
  0x65   : > { %523 = dma.hbm_to_vmem [thread:$0]  (!%p967_p6), %s963_s7, 128, %s971_s8, %s198_s14  }
  0x66   : > { %218 = sbr.rel (%p847_p5) target bundleno = 271 (0x10f), region = 36  ;;  %p1116_p4 = scmp.eq.s32.totalorder (!%p847_p5), %s840_s26, 0 }
  0x6d   : > { %724 = dma.done.wait (%p1116_p4), [#allocation6], 16   ;;  %p1117_p1 = pmov %p1116_p4 }
  0x6e   : > { %s1004_s16 = sand.u32 1, %s757_s21   ;;  %p1118_p7 = scmp.ne.s32.totalorder %s1107_s10, 0 }
  0x6f   : > { %726 = vsyncadd (%p1117_p1), [#allocation6], 4294967280  ;;  %s1104_s6 = sshll.u32 %s1004_s16, 3  ;;  %s225_s24 = scalar_lea.sflag [#allocation4], %s1004_s16 }
  0x70   : > { %s228_s7 = scalar_lea.vmem [#allocation7], %s1104_s6 }
  0x71   : > { %728 = dma.done.wait (%p1118_p7), %s225_s24, 128  }
  0x72   : > { %730 = vsyncadd (%p1118_p7), %s225_s24, 4294967168  ;;  %s233_s27 = sand.u32 1, %s745_s18   ;;  %p1119_p5 = scmp.ne.s32.totalorder %s1113_s12, 0 }
  0x73   : > { %s489_s8 = sshll.u32 %s233_s27, 3  ;;  %s234_s14 = scalar_lea.sflag [#allocation9], %s233_s27 }
  0x74   : > { %s237_s28 = scalar_lea.vmem [#allocation8], %s489_s8 }
  0x75   : > { %732 = dma.done.wait (%p1119_p5), %s234_s14, 128  }
  0x76   : > { %734 = vsyncadd (%p1119_p5), %s234_s14, 4294967168 }
  0x77   : > { %242 = sfence }
  0x78   : > { %s491_s17 = sld [smem:[#allocation3 + $0x1]]  ;;  %s494_s29 = sld [smem:[#allocation3 + $0x4]]  ;;  %v278_v0 = vld [vmem:[%s228_s7] sm:$0xff]  ;;  %v279_v1 = vld [vmem:[%s237_s28] sm:$0xff]  ;;  %vm289_vm0 = vcmask 1046528   ;;  %vm300_vm1 = vcmask 1045504  }
  0x79   : > { %s497_s5 = sld [smem:[#allocation3 + $0x7]]  ;;  %s492_s15 = sld [smem:[#allocation3 + $0x2]] }
  0x7a   : > { %s495_s25 = sld [smem:[#allocation3 + $0x5]]  ;;  %s498_s6 = sld [smem:[#allocation3 + $0x8]] }
  0x7b   : > { %s1019_s10 = sld [smem:[#allocation3 + $0x3]]  ;;  %s1021_s24 = sld [smem:[#allocation3 + $0x6]] }
  0x7c   : > { %s1023_s12 = sld [smem:[#allocation3]]  ;;  %s771_s7 = smov 126  }
  0x7d   : > { %s280_s27 = sld [smem:[#allocation2]]  ;;  %s500_s8 = sshll.u32 %s840_s26, 7 }
  0x7e   : > { %v307_v2 = vstv %s491_s17  ;;  %v309_v3 = vstv %s494_s29  ;;  %s1120_s14 = sshll.u32 %s1004_s16, 3  ;;  %p1121_p0 = scmp.ne.s32.totalorder %s1108_s11, 0 }
  0x7f   : > { %v308_v4 = vmul.f32 %v307_v2, %v278_v0  ;;  %v310_v5 = vmul.f32 %v309_v3, %v278_v0  ;;  %v311_v6 = vmul.f32 %v309_v3, %v279_v1  ;;  %v319_v7 = vstv %s497_s5  ;;  %s267_s28 = scalar_lea.vmem [#allocation10], %s1120_s14  ;;  %s772_s26 = smov [#allocation10]  }
  0x80   : > { %v320_v8 = vmul.f32 %v319_v7, %v278_v0  ;;  %v321_v9 = vmul.f32 %v319_v7, %v279_v1  ;;  %v332_v10 = vstv %s492_s15  ;;  %v334_v11 = vstv %s495_s25  ;;  %s372_s17 = sshll.u32 %s267_s28, 4  ;;  %s1040_s15 = scalar_lea.hbm %s1097_s4, %s500_s8  ;;  %s1042_s17 = int_to_ptr.vmem [resolvable:$true] %s372_s17 }
  0x81   : > { %v314_v12 = vrot.slane %v310_v5, 1  ;;  %v315_v13 = vrot.slane %v311_v6, 1  ;;  %v333_v14 = vmul.f32 %v332_v10, %v278_v0  ;;  %v335_v15 = vmul.f32 %v334_v11, %v278_v0  ;;  %s359_s25 = scalar_lea.sflag [#allocation5], %s1004_s16 }
  0x82   : > { %v324_v16 = vrot.slane %v320_v8, 2  ;;  %v325_v17 = vrot.slane %v321_v9, 2  ;;  %v336_v18 = vmul.f32 %v334_v11, %v279_v1  ;;  %v344_v19 = vstv %s498_s6  ;;  %s770_s6 = smov 127  }
  0x83   : > { %v316_v20 = vsel %vm289_vm0, %v314_v12, %v315_v13  ;;  %v339_v21 = vrot.slane %v335_v15, 1  ;;  %v345_v22 = vmul.f32 %v344_v19, %v278_v0  ;;  %v346_v23 = vmul.f32 %v344_v19, %v279_v1 }
  0x84   : > { %v318_v24 = vadd.f32 %v316_v20, %v308_v4  ;;  %v326_v25 = vsel %vm300_vm1, %v324_v16, %v325_v17  ;;  %v340_v26 = vrot.slane %v336_v18, 1  ;;  %v284_v29 = vstv %s1019_s10  ;;  %s667_s10 = scalar_lea.vmem %s1042_s17, 128 }
  0x85   : > { %v349_v27 = vrot.slane %v345_v22, 2  ;;  %v350_v28 = vrot.slane %v346_v23, 2  ;;  %v295_v30 = vstv %s1021_s24  ;;  %v285_v33 = vmul.f32 %v284_v29, %v278_v0  ;;  %p668_p6 = scmp.ne.s32.totalorder %s1042_s17, %s667_s10  ;;  %s671_s24 = sshll.u32 %s772_s26, 4  ;;  %s672_s24 = int_to_ptr.vmem [resolvable:$false] %s671_s24 }
  0x86   : > { %v328_v31 = vadd.f32 %v326_v25, %v318_v24  ;;  %v341_v32 = vsel %vm289_vm0, %v339_v21, %v340_v26  ;;  %v286_v34 = vmul.f32 %v284_v29, %v279_v1  ;;  %v296_v37 = vmul.f32 %v295_v30, %v278_v0  ;;  %p674_p2 = scmp.lt.s32.totalorder %s1042_s17, %s672_s24 }
  0x87   : > { %v343_v35 = vadd.f32 %v341_v32, %v333_v14  ;;  %v351_v36 = vsel %vm300_vm1, %v349_v27, %v350_v28  ;;  %v297_v38 = vmul.f32 %v295_v30, %v279_v1  ;;  %v290_v39 = vrot.slane %v285_v33, 1  ;;  %p669_p3 = pnand %p668_p6, %p1121_p0 }
  0x88   : > { %329 = vrot.lane.b32.xlu0 %v328_v31, %s770_s6  ;;  %v291_v40 = vrot.slane %v286_v34, 1  ;;  %v282_v41 = vstv %s1023_s12  ;;  %v301_v43 = vrot.slane %v296_v37, 2  ;;  %v281_v50 = vstv %s280_s27  ;;  %s673_s12 = scalar_lea.vmem %s672_s24, 256 }
  0x89   : > { %v353_v42 = vadd.f32 %v351_v36, %v343_v35  ;;  %v302_v44 = vrot.slane %v297_v38, 2  ;;  %v283_v45 = vmul.f32 %v282_v41, %v278_v0  ;;  %p670_p8 = pneg %p669_p3  ;;  %p675_p10 = scmp.lt.s32.totalorder %s673_s12, %s667_s10 }
  0x8a   : > { %v292_v46 = vsel %vm289_vm0, %v290_v39, %v291_v40 }
  0x8b   : > { %v303_v47 = vsel %vm300_vm1, %v301_v43, %v302_v44  ;;  %v294_v48 = vadd.f32 %v292_v46, %v283_v45  ;;  %p676_p11 = por %p675_p10, %p674_p2 }
  0x8c   : > { %354 = vrot.lane.b32.xlu0 %v353_v42, %s771_s7 }
  0x8d   : > { %v305_v49 = vadd.f32 %v303_v47, %v294_v48  ;;  %p677_p9 = pnand %p676_p11, %p670_p8 }
  0x8f   : > { %v306_v51 = vadd.f32 %v305_v49, %v281_v50 }
  0xfa   : > { %v330_v52 = vpop.permute.xlu0 %329 }
  0xfb   : > { %v331_v53 = vadd.f32 %v330_v52, %v306_v51 }
  0xfe   : > { %v355_v54 = vpop.permute.xlu0 %354 }
  0xff   : > { %v356_v55 = vadd.f32 %v355_v54, %v331_v53 }
 0x101   : > { %357 = vst [vmem:[%s267_s28] sm:$0xff] %v356_v55 }
 0x102   : > { %680 = shalt.err (!%p677_p9)
}
 0x103   : > { %s681_s16 = scalar_lea.hbm %s1040_s15, 128  ;;  %s685_s27 = scalar_lea.hbm %s1097_s4, 256 }
 0x104   : > { %p682_p12 = scmp.ne.s32.totalorder %s1040_s15, %s681_s16  ;;  %p686_p1 = scmp.lt.u32.totalorder %s1040_s15, %s1097_s4 }
 0x105   : > { %p687_p7 = scmp.lt.u32.totalorder %s685_s27, %s681_s16  ;;  %p689_p6 = scmp.lt.u32.totalorder %s681_s16, %s1040_s15 }
 0x106   : > { %p683_p13 = pnand %p682_p12, %p1121_p0 }
 0x107   : > { %p688_p5 = por %p687_p7, %p686_p1 }
 0x108   : > { %p684_p4 = pneg %p683_p13 }
 0x109   : > { %p690_p3 = por %p689_p6, %p688_p5 }
 0x10b   : > { %p691_p8 = pnand %p690_p3, %p684_p4 }
 0x10d   : > { %694 = shalt.err (!%p691_p8)
}
 0x10e   : > { %511 = dma.vmem_to_hbm [thread:$0]  (%p1121_p0), %s1042_s17, 128, %s1040_s15, %s359_s25  }
 0x10f PF: > { %s384_s28 = sand.u32 1, %s753_s20   ;;  %p1122_p2 = scmp.ne.s32.totalorder %s1109_s13, 0 }
 0x110   : > { %p1123_p10 = scmp.ge.s32.totalorder %s765_s1, 2  ;;  %s385_s29 = scalar_lea.sflag [#allocation5], %s384_s28 }
 0x112   : > { %p525_p11 = pnand %p1123_p10, %p1122_p2 }
 0x114   : > { %736 = dma.done.wait (!%p525_p11), %s385_s29, 128  }
 0x115   : > { %738 = vsyncadd (!%p525_p11), %s385_s29, 4294967168  ;;  %p22_p0 = scmp.ge.s32.totalorder %s861_s30, 4   ;;  %s1124_s17 = smov %s745_s18 }
 0x116   : > { %s1125_s18 = smov %s749_s19  ;;  %s1126_s19 = smov %s950_s23 }
 0x117   : > { %s1127_s20 = smov %s757_s21  ;;  %s1128_s21 = smov %s761_s22 }
 0x118   : > { %s1129_s22 = smov %s876_s9  ;;  %s1130_s1 = smov %s861_s30 }
 0x119   :  { %24 = sbr.rel (!%p22_p0) target bundleno = 12 (0xc), region = 99 }
 0x120   :  { %390 = vsyncpa [#allocation4], 1 }
 0x121   :  { %392 = vsyncpa [#allocation4 + $0x1], 1 }
 0x122   :  { %393 = vsyncpa [#allocation9], 1 }
 0x123   :  { %395 = vsyncpa [#allocation9 + $0x1], 1 }
 0x124   :  { %396 = vsyncpa [#allocation5], 1 }
 0x125   :  { %398 = vsyncpa [#allocation5 + $0x1], 1 }
 0x126   :  { %399 = vsyncpa [#allocation6], 1 }
 0x127   :  { %401 = vsyncpa [#allocation6 + $0x1], 1 }

</bundles_post_ra>
